<compile_context>
chip_gen: v7x
topology: tpu7x:2x2x1
jax: 0.10.0
libtpu: 0.0.40
codegen_flags: <defaults>
</compile_context>

<pallas_src>
import numpy as np
import jax
import jax.numpy as jnp
from jax import lax
from jax.experimental import pallas as pl
from jax.experimental.pallas import tpu as pltpu

# ----------------------------------------------------------------------------
# Module-consistent configuration
# ----------------------------------------------------------------------------
MAX_FRAMES = 8                                   # T (number of STFT frames)
FILTER_LENGTH = 64                               # n_fft / transposed-conv kernel
HOP_LENGTH = 16                                  # stride
WIN_LENGTH = 64
CUTOFF = FILTER_LENGTH // 2 + 1                  # 33
CT = CUTOFF * MAX_FRAMES                         # 264 (flattened (c, t) axis)
L_FULL = FILTER_LENGTH + HOP_LENGTH * (MAX_FRAMES - 1)   # conv_transpose output len = 176
L_OUT = L_FULL - FILTER_LENGTH                   # trimmed output length = 112
L_PAD = ((L_OUT + 127) // 128) * 128             # lane-dense padded width = 128
K_COS_PAD = ((CT + 127) // 128) * 128            # 384 : 128-aligned start of sin half
K_TOTAL = K_COS_PAD + CT                         # 648 : fused reduction dim (MXU pads to 768)
BM_MAX = 128                                     # batch rows per grid block (batched path)


# ----------------------------------------------------------------------------
# Host-side deterministic parameter construction (mirrors STFT.__init__)
# ----------------------------------------------------------------------------
def _hann_periodic(n):
    # scipy.signal.get_window("hann", n, fftbins=True)
    return 0.5 - 0.5 * np.cos(2.0 * np.pi * np.arange(n) / n)


def _pad_center(w, size):
    lpad = (size - len(w)) // 2
    return np.pad(w, (lpad, size - len(w) - lpad))


def build_istft_params():
    """Builds per-half synthesis matrices M_cos/M_sin (CT, L_PAD) + reference data.

    Row (c*T + t) of M_cos is inverse_basis[c, :] placed at offset t*hop in the
    full conv_transpose output, multiplied by the per-sample window_sum / scale
    correction, trimmed to [fl/2, L_FULL - fl/2) and zero-padded to 128 lanes.
    M_sin uses inverse_basis[CUTOFF + c, :].
    """
    scale = FILTER_LENGTH / HOP_LENGTH
    fourier_basis = np.fft.fft(np.eye(FILTER_LENGTH))
    fourier_basis = np.vstack(
        [np.real(fourier_basis[:CUTOFF, :]), np.imag(fourier_basis[:CUTOFF, :])]
    )                                                        # (2C, FL)
    inverse_basis = np.linalg.pinv(scale * fourier_basis).T  # (2C, FL)

    fft_window = _pad_center(_hann_periodic(WIN_LENGTH), FILTER_LENGTH)
    inverse_basis = inverse_basis * fft_window[None, :]

    # librosa window_sumsquare (norm=None -> window unchanged)
    win_sq = _pad_center(_hann_periodic(WIN_LENGTH) ** 2, FILTER_LENGTH)
    window_sum = np.zeros(L_FULL, dtype=np.float32)
    for i in range(MAX_FRAMES):
        s = i * HOP_LENGTH
        n_take = max(0, min(FILTER_LENGTH, L_FULL - s))
        window_sum[s:min(L_FULL, s + FILTER_LENGTH)] += win_sq[:n_take].astype(np.float32)

    tiny_v = np.finfo(np.float32).tiny
    # fold (divide-where-nonzero) and (* filter_length/hop) into one vector
    corr = np.where(window_sum > tiny_v, scale / window_sum, scale)   # (L_FULL,)

    half = FILTER_LENGTH // 2
    m_cos = np.zeros((CT, L_PAD), dtype=np.float32)
    m_sin = np.zeros((CT, L_PAD), dtype=np.float32)
    for t in range(MAX_FRAMES):
        s = t * HOP_LENGTH
        full_cos = np.zeros((CUTOFF, L_FULL))
        full_sin = np.zeros((CUTOFF, L_FULL))
        full_cos[:, s:s + FILTER_LENGTH] = inverse_basis[:CUTOFF]
        full_sin[:, s:s + FILTER_LENGTH] = inverse_basis[CUTOFF:]
        # rows c*T + t for c = 0..C-1  (matches (B, C, T).reshape(B, C*T))
        m_cos[t::MAX_FRAMES, :L_OUT] = (full_cos * corr[None, :])[:, half:L_FULL - half]
        m_sin[t::MAX_FRAMES, :L_OUT] = (full_sin * corr[None, :])[:, half:L_FULL - half]

    return m_cos, m_sin, inverse_basis.astype(np.float32), window_sum, tiny_v


def build_fused_weight(m_cos, m_sin):
    """Single fused synthesis weight: cos rows at [0, CT), sin rows at the
    128-aligned offset [K_COS_PAD, K_COS_PAD + CT); stored bf16 (halved DMA,
    native single-pass MXU)."""
    w = np.zeros((K_TOTAL, L_PAD), dtype=np.float32)
    w[:CT] = m_cos
    w[K_COS_PAD:K_COS_PAD + CT] = m_sin
    return jnp.asarray(w, dtype=jnp.bfloat16)


# ----------------------------------------------------------------------------
# Pallas kernel: phase recombination + one fused bf16 MXU matmul
# ----------------------------------------------------------------------------
def istft_kernel(mag_ref, x_ref, y_ref, w_ref, out_ref):
    # mag/x/y refs: (bm, CT) in native (c, t) flattened order (f32)
    # w_ref       : (K_TOTAL, L_PAD) fused bf16 synthesis weight
    # out_ref     : (bm, L_PAD) f32, lane-dense
    mag = mag_ref[...]
    xr = x_ref[...]
    yi = y_ref[...]
    bm = mag.shape[0]

    # cos(atan2(y, x)) = x * rsqrt(x^2+y^2); sin(atan2(y, x)) = y * rsqrt(...).
    # One EUP rsqrt; inv_m = mag * rsqrt shared by both halves. All f32 (v5e
    # has no bf16 VPU/EUP path) -- only the dot inputs are cast to bf16.
    r2 = xr * xr + yi * yi
    nz = r2 > 0.0
    inv_m = mag * jnp.where(nz, lax.rsqrt(r2), 0.0)
    a_cos = jnp.where(nz, xr * inv_m, mag)   # atan2(0,0)=0 -> cos=1 -> mag
    a_sin = yi * inv_m                       #               -> sin=0 (inv_m==0 there)

    # Lane-aligned fused activation: [cos | zero-fill to 384 | sin] -> (bm, 648).
    fill = jnp.zeros((bm, K_COS_PAD - CT), dtype=jnp.float32)
    act = jnp.concatenate([a_cos, fill, a_sin], axis=-1)

    # Single MXU matmul: bf16 x bf16 inputs, f32 accumulation.
    out_ref[...] = jnp.dot(act.astype(jnp.bfloat16), w_ref[...],
                           preferred_element_type=jnp.float32)


# ----------------------------------------------------------------------------
# Wrapper
# ----------------------------------------------------------------------------
def exportable_istft(mag_ncl, x_ncl, y_ncl, w_fused):
    """mag/x/y in PyTorch NCL layout (B, cutoff, T). Returns (B, 1, (T-1)*hop)."""
    B, C, T = mag_ncl.shape
    ct = C * T
    assert ct == CT, (ct, CT)

    # contiguous reshape -> free view, no transpose / relayout in the wrapper
    mag_f = mag_ncl.reshape(B, ct)
    x_f = x_ncl.reshape(B, ct)
    y_f = y_ncl.reshape(B, ct)

    if B <= BM_MAX:
        # Grid-less call: whole arrays resident in VMEM, no pipeline machinery.
        out_full = pl.pallas_call(
            istft_kernel,
            out_shape=jax.ShapeDtypeStruct((B, L_PAD), jnp.float32),
        )(mag_f, x_f, y_f, w_fused)
        return out_full[:, :L_OUT].reshape(B, 1, L_OUT)

    # Batched path: 128-row batch blocks over a "parallel" grid axis
    # (second TensorCore on v7x). Weight block index is constant across the
    # grid, so the fused weight is fetched once, not per block.
    nb = pl.cdiv(B, BM_MAX)
    b_pad = nb * BM_MAX
    if b_pad != B:
        pad = ((0, b_pad - B), (0, 0))
        mag_f = jnp.pad(mag_f, pad)
        x_f = jnp.pad(x_f, pad)
        y_f = jnp.pad(y_f, pad)

    act_spec = pl.BlockSpec((BM_MAX, ct), lambda i: (i, 0))
    out_full = pl.pallas_call(
        istft_kernel,
        out_shape=jax.ShapeDtypeStruct((b_pad, L_PAD), jnp.float32),
        grid=(nb,),
        in_specs=[
            act_spec,
            act_spec,
            act_spec,
            pl.BlockSpec((K_TOTAL, L_PAD), lambda i: (0, 0)),
        ],
        out_specs=pl.BlockSpec((BM_MAX, L_PAD), lambda i: (i, 0)),
        compiler_params=pltpu.CompilerParams(dimension_semantics=("parallel",)),
    )(mag_f, x_f, y_f, w_fused)
    return out_full[:B, :L_OUT].reshape(B, 1, L_OUT)


# ----------------------------------------------------------------------------
# Pure-numpy reference (literal PyTorch semantics) for verification
# ----------------------------------------------------------------------------
def reference(mag, x, y, inv_basis, window_sum, tiny_v):
    phase = np.arctan2(y, x)
    rec = np.concatenate([mag * np.cos(phase), mag * np.sin(phase)], axis=1)  # (B, 2C, T)
    B, _, T = rec.shape
    frames = np.einsum('bct,cl->btl',
                       rec.astype(np.float64), inv_basis.astype(np.float64))  # (B, T, FL)
    out = np.zeros((B, L_FULL), np.float64)
    for t in range(T):
        out[:, t * HOP_LENGTH:t * HOP_LENGTH + FILTER_LENGTH] += frames[:, t]
    mask = window_sum > tiny_v
    out[:, mask] /= window_sum[mask]
    out *= float(FILTER_LENGTH) / HOP_LENGTH
    out = out[:, FILTER_LENGTH // 2:L_FULL - FILTER_LENGTH // 2]
    return out[:, None, :].astype(np.float32)


if __name__ == "__main__":
    m_cos_np, m_sin_np, inv_basis_np, window_sum_np, tiny_v = build_istft_params()
    w_fused = build_fused_weight(m_cos_np, m_sin_np)

    key = jax.random.PRNGKey(0)
    k = jax.random.split(key, 6)

    # bf16 MXU weights/activations with f32 accumulation: tolerance sized for
    # bf16 rounding of the ~264-term reductions (wrong semantics would be O(0.1)).
    ATOL = 5e-3
    RTOL = 5e-3

    # --- Test 1: tiny batch, grid-less path -------------------------------
    B1 = 2
    mag1 = jax.random.uniform(k[0], (B1, CUTOFF, MAX_FRAMES), dtype=jnp.float32)
    x1 = jax.random.normal(k[1], (B1, CUTOFF, MAX_FRAMES), dtype=jnp.float32)
    y1 = jax.random.normal(k[2], (B1, CUTOFF, MAX_FRAMES), dtype=jnp.float32)
    out1 = jax.block_until_ready(exportable_istft(mag1, x1, y1, w_fused))
    ref1 = reference(np.asarray(mag1), np.asarray(x1), np.asarray(y1),
                     inv_basis_np, window_sum_np, tiny_v)
    assert out1.shape == ref1.shape, (out1.shape, ref1.shape)
    err1 = float(np.max(np.abs(np.asarray(out1) - ref1)))
    assert np.allclose(np.asarray(out1), ref1, atol=ATOL, rtol=RTOL), err1

    # --- Test 2: batched path (grid over 128-row blocks, "parallel") ------
    B2 = 160
    mag2 = jax.random.uniform(k[3], (B2, CUTOFF, MAX_FRAMES), dtype=jnp.float32)
    x2 = jax.random.normal(k[4], (B2, CUTOFF, MAX_FRAMES), dtype=jnp.float32)
    y2 = jax.random.normal(k[5], (B2, CUTOFF, MAX_FRAMES), dtype=jnp.float32)
    out2 = jax.block_until_ready(exportable_istft(mag2, x2, y2, w_fused))
    ref2 = reference(np.asarray(mag2), np.asarray(x2), np.asarray(y2),
                     inv_basis_np, window_sum_np, tiny_v)
    assert out2.shape == ref2.shape, (out2.shape, ref2.shape)
    err2 = float(np.max(np.abs(np.asarray(out2) - ref2)))
    assert np.allclose(np.asarray(out2), ref2, atol=ATOL, rtol=RTOL), err2

    print("KERNEL_OK")
</pallas_src>

<mosaic_0001>
module attributes {stable_mosaic.version = 11 : i64} {
  func.func @istft_kernel(%arg0: memref<2x264xf32, #tpu.memory_space<vmem>>, %arg1: memref<2x264xf32, #tpu.memory_space<vmem>>, %arg2: memref<2x264xf32, #tpu.memory_space<vmem>>, %arg3: memref<648x128xbf16, #tpu.memory_space<vmem>>, %arg4: memref<2x128xf32, #tpu.memory_space<vmem>>) attributes {dimension_semantics = [], scalar_prefetch = 0 : i64, scratch_operands = 0 : i64, tpu.core_type = #tpu.core_type<tc>} {
    %c0 = arith.constant 0 : index
    %c0_0 = arith.constant 0 : index
    %0 = vector.load %arg0[%c0, %c0_0] : memref<2x264xf32, #tpu.memory_space<vmem>>, vector<2x264xf32>
    %c0_1 = arith.constant 0 : index
    %c0_2 = arith.constant 0 : index
    %1 = vector.load %arg1[%c0_1, %c0_2] : memref<2x264xf32, #tpu.memory_space<vmem>>, vector<2x264xf32>
    %c0_3 = arith.constant 0 : index
    %c0_4 = arith.constant 0 : index
    %2 = vector.load %arg2[%c0_3, %c0_4] : memref<2x264xf32, #tpu.memory_space<vmem>>, vector<2x264xf32>
    %3 = arith.mulf %1, %1 : vector<2x264xf32>
    %4 = arith.mulf %2, %2 : vector<2x264xf32>
    %5 = arith.addf %3, %4 : vector<2x264xf32>
    %cst = arith.constant 0.000000e+00 : f32
    %6 = vector.broadcast %cst : f32 to vector<2x264xf32>
    %7 = arith.cmpf ogt, %5, %6 : vector<2x264xf32>
    %8 = math.rsqrt %5 : vector<2x264xf32>
    %cst_5 = arith.constant 0.000000e+00 : f32
    %9 = vector.broadcast %cst_5 : f32 to vector<2x264xf32>
    %10 = arith.select %7, %8, %9 : vector<2x264xi1>, vector<2x264xf32>
    %11 = arith.mulf %0, %10 : vector<2x264xf32>
    %12 = arith.mulf %1, %11 : vector<2x264xf32>
    %13 = arith.select %7, %12, %0 : vector<2x264xi1>, vector<2x264xf32>
    %14 = arith.mulf %2, %11 : vector<2x264xf32>
    %cst_6 = arith.constant 0.000000e+00 : f32
    %15 = vector.broadcast %cst_6 : f32 to vector<2x120xf32>
    %16 = tpu.concatenate %13, %15, %14 in 1 : vector<2x264xf32>, vector<2x120xf32>, vector<2x264xf32> -> vector<2x648xf32>
    %17 = arith.truncf %16 : vector<2x648xf32> to vector<2x648xbf16>
    %c0_7 = arith.constant 0 : index
    %c0_8 = arith.constant 0 : index
    %18 = vector.load %arg3[%c0_7, %c0_8] : memref<648x128xbf16, #tpu.memory_space<vmem>>, vector<648x128xbf16>
    %cst_9 = arith.constant dense<0.000000e+00> : vector<2x128xf32>
    %19 = tpu.matmul %17, %18, %cst_9 {dimension_numbers = #tpu.dot_dimension_numbers<[1], [0], [0], [1], [0, 0, 1, 1], [], []>} : vector<2x648xbf16>, vector<648x128xbf16>, vector<2x128xf32> -> vector<2x128xf32>
    %c0_10 = arith.constant 0 : index
    %c0_11 = arith.constant 0 : index
    %20 = vector.load %arg4[%c0_10, %c0_11] : memref<2x128xf32, #tpu.memory_space<vmem>>, vector<2x128xf32>
    tpu.vector_store %arg4[%c0_10, %c0_11], %19 {strides = array<i32>} : memref<2x128xf32, #tpu.memory_space<vmem>>, vector<2x128xf32>,
    return
  }
}

</mosaic_0001>

<bundles_post_ra>
// kernel: tpu_custom_call.1
= control target key start
LH: loop header
LB: loop body
LE: loop exit
PB: predicated region body
PF: predicated region fallthrough
CT: control target
= control target key end

     0   :  { %9 = vsyncpa [#allocation3], 0  ;;  %s923_s0 = inlined_call_operand.hbm [shape: f32[2,264], index: 0, kind: input, shape index: {}]   ;;  %s924_s1 = inlined_call_operand.hbm [shape: f32[2,264], index: 1, kind: input, shape index: {}]   ;;  %s925_s2 = inlined_call_operand.vmem [shape: f32[2,264], index: 2, kind: input, shape index: {}]   ;;  %s926_s3 = inlined_call_operand.hbm [shape: bf16[648,128], index: 3, kind: input, shape index: {}]   ;;  %s927_s4 = inlined_call_operand.hbm [shape: f32[2,128], index: 4, kind: output, shape index: {}]  }
   0x1   :  { %10 = vsyncpa [#allocation6], 0 }
   0x2   :  { %11 = vsyncpa [#allocation4], 0  ;;  %s819_s15 = smov [#allocation5]   ;;  %s820_s17 = smov [#allocation2]  }
   0x3   :  { %s28_s16 = sshll.u32 %s819_s15, 4  ;;  %s18_s18 = sshll.u32 %s820_s17, 4  ;;  %s29_s16 = int_to_ptr.vmem [resolvable:$true] %s28_s16  ;;  %s19_s18 = int_to_ptr.vmem [resolvable:$true] %s18_s18 }
   0x4   :  { %s725_s21 = scalar_lea.hbm %s924_s1, 96 }
   0x5   :  { %p726_p0 = scmp.ne.s32.totalorder %s924_s1, %s725_s21  ;;  %p729_p1 = scmp.lt.u32.totalorder %s725_s21, %s924_s1 }
   0x7   :  { %p731_p2 = pnand %p729_p1, %p726_p0 }
   0x9   :  { %734 = shalt.err (!%p731_p2)
}
   0xa   :  { %s735_s26 = scalar_lea.vmem %s29_s16, 96  ;;  %p740_p4 = scmp.lt.s32.totalorder %s29_s16, %s29_s16 }
   0xb   :  { %p736_p3 = scmp.ne.s32.totalorder %s29_s16, %s735_s26  ;;  %p741_p5 = scmp.lt.s32.totalorder %s735_s26, %s735_s26 }
   0xd   :  { %p742_p6 = por %p741_p5, %p740_p4 }
   0xf   :  { %p743_p7 = pnand %p742_p6, %p736_p3 }
  0x11   :  { %746 = shalt.err (!%p743_p7)
}
  0x12   :  { %31 = dma.hbm_to_vmem [thread:$0]  %s924_s1, 96, %s29_s16, [#allocation6]  }
  0x13   :  { %s747_s5 = scalar_lea.hbm %s923_s0, 96 }
  0x14   :  { %p748_p8 = scmp.ne.s32.totalorder %s923_s0, %s747_s5  ;;  %p751_p9 = scmp.lt.u32.totalorder %s747_s5, %s923_s0 }
  0x16   :  { %p753_p10 = pnand %p751_p9, %p748_p8 }
  0x18   :  { %756 = shalt.err (!%p753_p10)
}
  0x19   :  { %s757_s10 = scalar_lea.vmem %s19_s18, 96  ;;  %p762_p12 = scmp.lt.s32.totalorder %s19_s18, %s19_s18 }
  0x1a   :  { %p758_p11 = scmp.ne.s32.totalorder %s19_s18, %s757_s10  ;;  %p763_p13 = scmp.lt.s32.totalorder %s757_s10, %s757_s10 }
  0x1c   :  { %p764_p0 = por %p763_p13, %p762_p12 }
  0x1e   :  { %p765_p1 = pnand %p764_p0, %p758_p11 }
  0x20   :  { %768 = shalt.err (!%p765_p1)
}
  0x21   :  { %21 = dma.hbm_to_vmem [thread:$0]  %s923_s0, 96, %s19_s18, [#allocation3]  }
  0x22   :  { %s821_s12 = smov [#allocation7]   ;;  %s769_s16 = scalar_lea.hbm %s926_s3, 5184 }
  0x23   :  { %s39_s13 = sshll.u32 %s821_s12, 4  ;;  %p770_p2 = scmp.ne.s32.totalorder %s926_s3, %s769_s16  ;;  %s40_s13 = int_to_ptr.vmem [resolvable:$true] %s39_s13 }
  0x24   :  { %p773_p3 = scmp.lt.u32.totalorder %s769_s16, %s926_s3 }
  0x26   :  { %p775_p4 = pnand %p773_p3, %p770_p2 }
  0x28   :  { %778 = shalt.err (!%p775_p4)
}
  0x29   :  { %s779_s22 = scalar_lea.vmem %s40_s13, 5184  ;;  %p784_p6 = scmp.lt.s32.totalorder %s40_s13, %s40_s13 }
  0x2a   :  { %p780_p5 = scmp.ne.s32.totalorder %s40_s13, %s779_s22  ;;  %p785_p7 = scmp.lt.s32.totalorder %s779_s22, %s779_s22 }
  0x2c   :  { %p786_p8 = por %p785_p7, %p784_p6 }
  0x2e   :  { %p787_p9 = pnand %p786_p8, %p780_p5 }
  0x30   :  { %790 = shalt.err (!%p787_p9)
}
  0x31   :  { %s822_s0 = smov 64   ;;  %s823_s18 = smov 4  }
  0x32   :  { %45 = dma.hbm_to_vmem [thread:$0]  %s926_s3, 5184, %s40_s13, [#allocation6], %s822_s0, %s822_s0, %s823_s18  }
  0x33   :  { %813 = dma.done.wait [#allocation3], 96  }
  0x34   :  { %814 = vsyncadd [#allocation3], 4294967200 }
  0x35   :  { %815 = dma.done.wait [#allocation6], 5280  }
  0x36   :  { %816 = vsyncadd [#allocation6], 4294962016  ;;  %v824_v0 = vmov 0   ;;  %v682_v1 = vld [vmem:[#allocation7 + $0x40] sm:$0xff]   ;;  %v684_v3 = vld [vmem:[#allocation7 + $0x48] sm:$0xff]   ;;  %v74_v24 = vlaneseq  ;;  %vm109_vm1 = vcmask 64512  }
  0x37   :  { %528 = vmatprep.subr.bf16.mxu0 %v824_v0  ;;  %v683_v2 = vld [vmem:[#allocation7] sm:$0xff]   ;;  %630 = vmatprep.subr.bf16.mxu1 %v682_v1  ;;  %v685_v4 = vld [vmem:[#allocation7 + $0x8] sm:$0xff]   ;;  %v686_v5 = vld [vmem:[#allocation7 + $0x50] sm:$0xff]   ;;  %v825_v26 = vmov 1983009808   ;;  %vm444_vm2 = vcmask 1043456  }
  0x38   :  { %631 = vmatpush3.bf16.msra.mxu1 %v683_v2  ;;  %v687_v6 = vld [vmem:[#allocation7 + $0x10] sm:$0xff]   ;;  %v688_v7 = vld [vmem:[#allocation7 + $0x58] sm:$0xff]   ;;  %v690_v9 = vld [vmem:[#allocation7 + $0x60] sm:$0xff]   ;;  %v72_v27 = vunpack.c.l.s4 %v825_v26  ;;  %v75_v30 = vshrl.u32 %v74_v24, 7 }
  0x39   :  { %632 = vmatprep.subr.bf16.mxu1 %v684_v3  ;;  %v689_v8 = vld [vmem:[#allocation7 + $0x18] sm:$0xff]   ;;  %v691_v10 = vld [vmem:[#allocation7 + $0x20] sm:$0xff]   ;;  %v692_v11 = vld [vmem:[#allocation7 + $0x68] sm:$0xff]  }
  0x3a   :  { %v57_v12 = vld [vmem:[#allocation5] sm:$0x3f]  ;;  %v58_v13 = vld [vmem:[%s925_s2] sm:$0x3f]  ;;  %v698_v16 = vld [vmem:[#allocation7 + $0x100] sm:$0xff]   ;;  %v73_v32 = vunpack.c.0.s8 %v72_v27  ;;  %s826_s2 = smov [#allocation8]  }
  0x3b   :  { %v59_v14 = vmul.f32 %v57_v12, %v57_v12  ;;  %v60_v15 = vmul.f32 %v58_v13, %v58_v13  ;;  %v693_v17 = vld [vmem:[#allocation7 + $0x28] sm:$0xff]   ;;  %v694_v18 = vld [vmem:[#allocation7 + $0x70] sm:$0xff]   ;;  %529 = vmatpush1.bf16.msra.mxu0 %v698_v16  ;;  %v696_v23 = vld [vmem:[#allocation7 + $0x78] sm:$0xff]   ;;  %s575_s26 = sshll.u32 %s826_s2, 4  ;;  %s576_s26 = int_to_ptr.vmem [resolvable:$true] %s575_s26 }
  0x3c   :  { %633 = vmatpush3.bf16.msra.mxu1 %v685_v4  ;;  %530 = vmatprep.subr.bf16.mxu0 %v824_v0  ;;  %v701_v20 = vld [vmem:[#allocation7 + $0x108] sm:$0xff]   ;;  %v695_v21 = vld [vmem:[#allocation7 + $0x30] sm:$0xff]   ;;  %v697_v25 = vld [vmem:[#allocation7 + $0x38] sm:$0xff]   ;;  %v897_v37 = vsub.s32 %v73_v32, %v75_v30  ;;  %s791_s27 = scalar_lea.vmem %s576_s26, 32  ;;  %p796_p11 = scmp.lt.s32.totalorder %s576_s26, %s576_s26 }
  0x3d   :  { %634 = vmatprep.subr.bf16.mxu1 %v686_v5  ;;  %v61_v19 = vadd.f32 %v60_v15, %v59_v14  ;;  %v704_v22 = vld [vmem:[#allocation7 + $0x110] sm:$0xff]   ;;  %v707_v28 = vld [vmem:[#allocation7 + $0x118] sm:$0xff]   ;;  %v699_v29 = vld [vmem:[#allocation7 + $0xc0] sm:$0xff]   ;;  %p792_p10 = scmp.ne.s32.totalorder %s576_s26, %s791_s27  ;;  %p797_p12 = scmp.lt.s32.totalorder %s791_s27, %s791_s27 }
  0x3e   :  { %v56_v31 = vld [vmem:[#allocation2] sm:$0x3f]  ;;  %v710_v34 = vld [vmem:[#allocation7 + $0x120] sm:$0xff]   ;;  %v713_v39 = vld [vmem:[#allocation7 + $0x128] sm:$0xff]  }
  0x3f   :  { %723 = vrsqrt.f32 %v61_v19  ;;  %531 = vmatpush1.bf16.msra.mxu0 %v701_v20  ;;  %vm62_vm0 = vcmp.gt.f32.partialorder %v61_v19, 0.0  ;;  %v716_v45 = vld [vmem:[#allocation7 + $0x130] sm:$0xff]   ;;  %v700_v51 = vld [vmem:[#allocation7 + $0x80] sm:$0xff]   ;;  %v702_v53 = vld [vmem:[#allocation7 + $0xc8] sm:$0xff]   ;;  %p798_p13 = por %p797_p12, %p796_p11 }
  0x40   :  { %635 = vmatpush3.bf16.msra.mxu1 %v687_v6  ;;  %532 = vmatprep.subr.bf16.mxu0 %v824_v0  ;;  %v719_v54 = vld [vmem:[#allocation7 + $0x138] sm:$0xff]   ;;  %v722_v55 = vld [vmem:[#allocation7 + $0x140] ss:$0 sps:$4 sm:$0xff]   ;;  %v703_v56 = vld [vmem:[#allocation7 + $0x88] sm:$0xff]  }
  0x41   :  { %636 = vmatprep.subr.bf16.mxu1 %v688_v7  ;;  %v705_v58 = vld [vmem:[#allocation7 + $0xd0] sm:$0xff]   ;;  %v446_v59 = vsel %vm444_vm2, %v722_v55, 0  ;;  %v708_v62 = vld [vmem:[#allocation7 + $0xd8] sm:$0xff]   ;;  %v711_v1 = vld [vmem:[#allocation7 + $0xe0] sm:$0xff]   ;;  %p799_p0 = pnand %p798_p13, %p792_p10 }
  0x42   :  { %v706_v60 = vld [vmem:[#allocation7 + $0x90] sm:$0xff]   ;;  %v709_v63 = vld [vmem:[#allocation7 + $0x98] sm:$0xff]   ;;  %v712_v2 = vld [vmem:[#allocation7 + $0xa0] sm:$0xff]  }
  0x43   :  { %533 = vmatpush1.bf16.msra.mxu0 %v704_v22  ;;  %v714_v3 = vld [vmem:[#allocation7 + $0xe8] sm:$0xff]   ;;  %v718_v6 = vld [vmem:[#allocation7 + $0xb0] sm:$0xff]   ;;  %v720_v7 = vld [vmem:[#allocation7 + $0xf8] sm:$0xff]  }
  0x44   :  { %637 = vmatpush3.bf16.msra.mxu1 %v689_v8  ;;  %534 = vmatprep.subr.bf16.mxu0 %v824_v0  ;;  %v715_v4 = vld [vmem:[#allocation7 + $0xa8] sm:$0xff]   ;;  %vm626_vm3 = vmpackc.low %vm109_vm1, %vm109_vm1 }
  0x45   :  { %638 = vmatprep.subr.bf16.mxu1 %v690_v9  ;;  %v721_v9 = vld [vmem:[#allocation7 + $0xb8] sm:$0xff]  }
  0x47   :  { %535 = vmatpush1.bf16.msra.mxu0 %v707_v28 }
  0x48   :  { %639 = vmatpush3.bf16.msra.mxu1 %v691_v10  ;;  %536 = vmatprep.subr.bf16.mxu0 %v824_v0 }
  0x49   :  { %640 = vmatprep.subr.bf16.mxu1 %v692_v11  ;;  %v724_v33 = vpop.eup %723 }
  0x4a   :  { %v64_v35 = vsel %vm62_vm0, %v724_v33, 0.0 }
  0x4b   :  { %v65_v36 = vmul.f32 %v64_v35, %v56_v31  ;;  %537 = vmatpush1.bf16.msra.mxu0 %v710_v34 }
  0x4c   :  { %641 = vmatpush3.bf16.msra.mxu1 %v693_v17  ;;  %538 = vmatprep.subr.bf16.mxu0 %v824_v0 }
  0x4d   :  { %642 = vmatprep.subr.bf16.mxu1 %v694_v18  ;;  %v66_v38 = vmul.f32 %v65_v36, %v57_v12  ;;  %v68_v40 = vmul.f32 %v65_v36, %v58_v13 }
  0x4f   :  { %v67_v41 = vsel %vm62_vm0, %v66_v38, %v56_v31  ;;  %v90_v42 = vcombine.high %v68_v40, %v68_v40  ;;  %v97_v44 = vrot.slane %v68_v40, %v897_v37  ;;  %539 = vmatpush1.bf16.msra.mxu0 %v713_v39 }
  0x50   :  { %643 = vmatpush3.bf16.msra.mxu1 %v695_v21  ;;  %v77_v43 = vrot.slane %v67_v41, %v897_v37  ;;  %540 = vmatprep.subr.bf16.mxu0 %v824_v0  ;;  %v70_v5 = vcombine.high %v67_v41, %v67_v41 }
  0x51   :  { %644 = vmatprep.subr.bf16.mxu1 %v696_v23  ;;  %v104_v46 = vrot.slane %v90_v42, %v897_v37  ;;  %v114_v52 = vpack.c.bf16 %v97_v44, %v97_v44  ;;  %v105_v57 = vcombine.high %v97_v44, %v97_v44 }
  0x52   :  { %v85_v47 = vcombine.high %v77_v43, %v77_v43  ;;  %v111_v48 = vpack.c.bf16 %v77_v43, %v77_v43  ;;  %v84_v8 = vrot.slane %v70_v5, %v897_v37 }
  0x53   :  { %v116_v49 = vpack.c.bf16 %v104_v46, %v104_v46  ;;  %541 = vmatpush1.bf16.msra.mxu0 %v716_v45  ;;  %v115_v61 = vpack.c.bf16 %v105_v57, %v105_v57 }
  0x54   :  { %645 = vmatpush3.bf16.msra.mxu1 %v697_v25  ;;  %v112_v50 = vpack.c.bf16 %v85_v47, %v85_v47  ;;  %542 = vmatprep.subr.bf16.mxu0 %v824_v0  ;;  %v627_v10 = vpack.c.bf16 %v84_v8, %v84_v8 }
  0x55   :  { %652 = vmatprep.subr.bf16.mxu1 %v699_v29  ;;  %629 = vmatprep.mubr.msk.bf16.mxu0 %vm109_vm1, %v116_v49 }
  0x56   :  { %480 = vmatprep.mubr.bf16.mxu1 %v112_v50 }
  0x57   :  { %481 = vmatmul.mubr.bf16.vlgmr.msra.gmra.mrb[0].mxu1 %v111_v48  ;;  %543 = vmatpush1.bf16.msra.mxu0 %v719_v54 }
  0x58   :  { %653 = vmatpush3.bf16.msra.mxu1 %v700_v51  ;;  %520 = vmatprep.mubr.bf16.mxu1 %v114_v52 }
  0x59   :  { %654 = vmatprep.subr.bf16.mxu1 %v702_v53  ;;  %544 = vmatprep.subr.bf16.mxu0 %v824_v0  ;;  %v717_v0 = vld [vmem:[#allocation7 + $0xf0] sm:$0xff]  }
  0x5b   :  { %545 = vmatpush1.bf16.msra.mxu0 %v446_v59 }
  0x5c   :  { %655 = vmatpush3.bf16.msra.mxu1 %v703_v56 }
  0x5d   :  { %656 = vmatprep.subr.bf16.mxu1 %v705_v58 }
  0x5e   :  { %561 = vmatmul.mubr.bf16.vlgmr.msra.gmra.mrb[0].mxu0 %v115_v61 }
  0x60   :  { %657 = vmatpush3.bf16.msra.mxu1 %v706_v60 }
  0x61   :  { %658 = vmatprep.subr.bf16.mxu1 %v708_v62 }
  0x64   :  { %659 = vmatpush3.bf16.msra.mxu1 %v709_v63 }
  0x65   :  { %660 = vmatprep.subr.bf16.mxu1 %v711_v1 }
  0x68   :  { %661 = vmatpush3.bf16.msra.mxu1 %v712_v2 }
  0x69   :  { %662 = vmatprep.subr.bf16.mxu1 %v714_v3 }
  0x6c   :  { %663 = vmatpush3.bf16.msra.mxu1 %v715_v4 }
  0x6d   :  { %664 = vmatprep.subr.bf16.mxu1 %v717_v0 }
  0x70   :  { %665 = vmatpush3.bf16.msra.mxu1 %v718_v6 }
  0x71   :  { %666 = vmatprep.subr.bf16.mxu1 %v720_v7 }
  0x74   :  { %667 = vmatpush3.bf16.msra.mxu1 %v721_v9 }
  0x77   :  { %628 = vmatmul.mubr.msk.bf16.vlgmr.msra.gmra.mrb[4].mxu1 %vm626_vm3, %v627_v10 }
 0x12a   :  { %v646_v11 = vpop.f32.mrb[0].mxu1 }
 0x12b   :  { %v647_v12 = vpop.f32.mrb[1].mxu1 }
 0x12c   :  { %v648_v13 = vadd.f32 %v647_v12, %v646_v11  ;;  %v649_v14 = vpop.f32.mrb[2].mxu1 }
 0x12d   :  { %v650_v15 = vpop.f32.mrb[3].mxu1 }
 0x131   :  { %v562_v16 = vpop.f32.mrb[0].mxu0 }
 0x132   :  { %v564_v17 = vpop.f32.mrb[1].mxu0 }
 0x133   :  { %v565_v18 = vpop.f32.mrb[2].mxu0 }
 0x134   :  { %v566_v19 = vpop.f32.mrb[3].mxu0 }
 0x14a   :  { %v668_v20 = vpop.f32.mrb[4].mxu1 }
 0x14b   :  { %v669_v21 = vpop.f32.mrb[5].mxu1 }
 0x14c   :  { %v670_v22 = vadd.f32 %v669_v21, %v668_v20  ;;  %v671_v23 = vpop.f32.mrb[6].mxu1 }
 0x14d   :  { %v672_v24 = vpop.f32.mrb[7].mxu1 }
 0x14e   :  { %v523_v25 = vadd.f32 %v670_v22, %v648_v13 }
 0x150   :  { %v563_v26 = vadd.f32 %v562_v16, %v523_v25 }
 0x152   :  { %568 = vst [vmem:[#allocation8] sm:$0x3] %v563_v26 }
 0x153   :  { %802 = shalt.err (!%p799_p0)
}
 0x154   :  { %s803_s30 = scalar_lea.hbm %s927_s4, 32 }
 0x155   :  { %p804_p1 = scmp.ne.s32.totalorder %s927_s4, %s803_s30  ;;  %p807_p2 = scmp.lt.u32.totalorder %s803_s30, %s927_s4 }
 0x157   :  { %p809_p3 = pnand %p807_p2, %p804_p1 }
 0x159   :  { %812 = shalt.err (!%p809_p3)
}
 0x15a   :  { %578 = dma.vmem_to_hbm [thread:$0]  %s576_s26, 32, %s927_s4, [#allocation4]  }
 0x15b   :  { %817 = dma.done.wait [#allocation4], 32  }
 0x15c   :  { %818 = vsyncadd [#allocation4], 4294967264 }
 0x15d   :  { %582 = vsyncpa [#allocation3], 1 }
 0x15e   :  { %583 = vsyncpa [#allocation6], 1 }
 0x15f   :  { %584 = vsyncpa [#allocation4], 1 }

</bundles_post_ra>
